<compile_context>
chip_gen: v6e
topology: v6e:2x2x1
jax: 0.10.0
libtpu: 0.0.40
codegen_flags: <defaults>
</compile_context>

<pallas_src>
import functools

import jax
import jax.numpy as jnp
from jax.experimental import pallas as pl
from jax.experimental.pallas import tpu as pltpu


def _round_up(x: int, m: int) -> int:
    return ((x + m - 1) // m) * m


def _cdiv(a: int, b: int) -> int:
    return -(-a // b)


# ---------------------------------------------------------------------------
# Kernels
# ---------------------------------------------------------------------------

def _single_pass_kernel(x_ref, out_ref, *, inv_hw):
    """H*W fits in one lane chunk: reduce the whole row tile in one shot (no scratch)."""
    x = x_ref[...].astype(jnp.float32)
    avg = jnp.sum(x, axis=-1, keepdims=True) * inv_hw
    mx = jnp.max(x, axis=-1, keepdims=True)
    out_ref[...] = jnp.concatenate([avg, mx], axis=-1).astype(out_ref.dtype)


def _multi_chunk_kernel(x_ref, out_ref, sum_acc, max_acc, *, hw, tile_hw, inv_hw):
    """H*W spans several lane chunks: lane-wide f32 accumulators in VMEM scratch."""
    k = pl.program_id(1)
    nk = pl.num_programs(1)

    @pl.when(k == 0)
    def _init():
        sum_acc[...] = jnp.zeros_like(sum_acc)
        max_acc[...] = jnp.full_like(max_acc, -jnp.inf)

    def _accumulate(x_sum, x_max):
        # Fold the (tile_nc, tile_hw) chunk down to (tile_nc, 128) partials with pure,
        # full-width VALU adds/maxes; the single cross-lane reduce happens in finalize.
        s = x_sum[:, 0:128]
        m = x_max[:, 0:128]
        for c in range(1, tile_hw // 128):
            lo, hi = c * 128, (c + 1) * 128
            s = s + x_sum[:, lo:hi]
            m = jnp.maximum(m, x_max[:, lo:hi])
        sum_acc[...] = sum_acc[...] + s
        max_acc[...] = jnp.maximum(max_acc[...], m)

    x = x_ref[...].astype(jnp.float32)

    rem = hw % tile_hw  # trace-time constant
    if rem == 0:
        _accumulate(x, x)
    else:
        # Only the last chunk contains out-of-bounds lanes -> mask only there.
        @pl.when(k < nk - 1)
        def _full():
            _accumulate(x, x)

        @pl.when(k == nk - 1)
        def _tail():
            col = jax.lax.broadcasted_iota(jnp.int32, x.shape, 1)
            valid = col < rem
            _accumulate(jnp.where(valid, x, 0.0), jnp.where(valid, x, -jnp.inf))

    @pl.when(k == nk - 1)
    def _finalize():
        avg = jnp.sum(sum_acc[...], axis=-1, keepdims=True) * inv_hw
        mx = jnp.max(max_acc[...], axis=-1, keepdims=True)
        out_ref[...] = jnp.concatenate([avg, mx], axis=-1).astype(out_ref.dtype)


# ---------------------------------------------------------------------------
# Wrapper
# ---------------------------------------------------------------------------

def adaptive_avg_max_pool2d(x: jax.Array) -> jax.Array:
    """Equivalent of AdaptiveAvgMaxPool2d(pool_output_size=1).forward(x).

    Args:
      x: NCHW array of shape (N, C, H, W).
    Returns:
      NCHW array of shape (N, 2*C, 1, 1): [avg_pooled, max_pooled] concatenated
      along the channel axis.
    """
    N, C, H, W = x.shape
    nc = N * C
    hw = H * W
    x2 = x.reshape(nc, hw)  # free row-major collapse; no extra HBM pass

    itemsize = jnp.dtype(x.dtype).itemsize
    sublane = max(8, 32 // itemsize)  # 8 for f32, 16 for bf16, 32 for 1-byte dtypes

    MAX_SINGLE_HW = 8192              # single reduction chunk if hw fits
    CHUNK_HW = 4096                   # multi-chunk lane width (multiple of 128)
    TARGET_TILE_BYTES = 8 * 1024 * 1024

    if hw <= MAX_SINGLE_HW:
        lane_w = hw                   # exact extent: no lane padding, no mask
        grid_k = 1
    else:
        lane_w = CHUNK_HW
        grid_k = _cdiv(hw, CHUNK_HW)

    # Row tiling: ~8 MiB tiles (VMEM footprint counts the 128-lane padding).
    vmem_lane = _round_up(lane_w, 128)
    rows_budget = max(sublane, TARGET_TILE_BYTES // (vmem_lane * itemsize))
    rows_budget = (rows_budget // sublane) * sublane

    tile_nc = nc if nc <= rows_budget else rows_budget
    # v7x: keep >=2 blocks on the parallel row axis so both TensorCores get work.
    if nc >= 2 * sublane:
        tile_nc = min(tile_nc, _round_up(_cdiv(nc, 2), sublane))
    grid_i = _cdiv(nc, tile_nc)

    # VMEM budget derived from real usage (2 input buffers + accumulators + headroom),
    # capped below v7x's 64 MiB per-core VMEM.
    in_tile_vmem = _round_up(tile_nc, sublane) * vmem_lane * itemsize
    acc_vmem = 2 * _round_up(tile_nc, 8) * 128 * 4 if grid_k > 1 else 0
    vmem_limit = 2 * in_tile_vmem + acc_vmem + 4 * 1024 * 1024
    vmem_limit = min(max(vmem_limit, 16 * 1024 * 1024), 48 * 1024 * 1024)

    out_shape = jax.ShapeDtypeStruct((nc, 2), x.dtype)  # lane 0 = avg, lane 1 = max

    if grid_k == 1:
        out = pl.pallas_call(
            functools.partial(_single_pass_kernel, inv_hw=1.0 / float(hw)),
            grid=(grid_i,),
            in_specs=[pl.BlockSpec((tile_nc, hw), lambda i: (i, 0))],
            out_specs=pl.BlockSpec((tile_nc, 2), lambda i: (i, 0)),
            out_shape=out_shape,
            compiler_params=pltpu.CompilerParams(
                dimension_semantics=("parallel",),
                vmem_limit_bytes=int(vmem_limit),
            ),
        )(x2)
    else:
        out = pl.pallas_call(
            functools.partial(_multi_chunk_kernel, hw=hw, tile_hw=CHUNK_HW,
                              inv_hw=1.0 / float(hw)),
            grid=(grid_i, grid_k),
            in_specs=[pl.BlockSpec((tile_nc, CHUNK_HW), lambda i, k: (i, k))],
            out_specs=pl.BlockSpec((tile_nc, 2), lambda i, k: (i, 0)),
            out_shape=out_shape,
            scratch_shapes=[
                pltpu.VMEM((tile_nc, 128), jnp.float32),  # running per-lane sum
                pltpu.VMEM((tile_nc, 128), jnp.float32),  # running per-lane max
            ],
            compiler_params=pltpu.CompilerParams(
                dimension_semantics=("parallel", "arbitrary"),
                vmem_limit_bytes=int(vmem_limit),
            ),
        )(x2)

    avg = out[:, 0].reshape(N, C, 1, 1)
    mx = out[:, 1].reshape(N, C, 1, 1)
    return jnp.concatenate([avg, mx], axis=1)


if __name__ == "__main__":
    key = jax.random.PRNGKey(0)

    # Primary small shape plus shapes that exercise: non-multiple-of-8 N*C rows,
    # non-multiple-of-128 spatial lanes, a larger single-chunk extent, and the
    # multi-chunk accumulator path with a masked tail chunk.
    shapes = [
        (2, 4, 16, 16),   # primary
        (2, 3, 7, 7),     # nc=6, hw=49 (odd row/lane extents, no padding needed)
        (1, 2, 72, 72),   # hw=5184 single-chunk, not a multiple of 128
        (1, 2, 96, 96),   # hw=9216 > 8192 -> multi-chunk accumulators + tail mask
    ]
    for shp in shapes:
        key, sub = jax.random.split(key)
        x = jax.random.normal(sub, shp, dtype=jnp.float32)

        out = jax.block_until_ready(adaptive_avg_max_pool2d(x))

        # Reference (mirrors the PyTorch forward: cat([avg_pool, max_pool], dim=1)).
        ref_avg = jnp.mean(x, axis=(2, 3), keepdims=True)
        ref_max = jnp.max(x, axis=(2, 3), keepdims=True)
        ref = jnp.concatenate([ref_avg, ref_max], axis=1)

        assert out.shape == (shp[0], 2 * shp[1], 1, 1), (out.shape, shp)
        assert jnp.allclose(out, ref, atol=1e-5, rtol=1e-5), f"mismatch for {shp}"

    print("KERNEL_OK")
</pallas_src>

<mosaic_0001>
module attributes {stable_mosaic.version = 11 : i64} {
  func.func @_single_pass_kernel(%arg0: i32, %arg1: memref<8x256xf32, #tpu.memory_space<vmem>>, %arg2: memref<8x2xf32, #tpu.memory_space<vmem>>) attributes {dimension_semantics = [#tpu.dimension_semantics<parallel>], iteration_bounds = array<i64: 1>, scalar_prefetch = 0 : i64, scratch_operands = 0 : i64, tpu.core_type = #tpu.core_type<tc>, window_params = [{transform_indices = @transform_0, window_bounds = array<i64: 8, 256>}, {transform_indices = @transform_1, window_bounds = array<i64: 8, 2>}]} {
    %c0 = arith.constant 0 : index
    %c0_0 = arith.constant 0 : index
    %0 = vector.load %arg1[%c0, %c0_0] : memref<8x256xf32, #tpu.memory_space<vmem>>, vector<8x256xf32>
    %cst = arith.constant dense<0.000000e+00> : vector<8xf32>
    %1 = vector.multi_reduction <add>, %0, %cst [1] : vector<8x256xf32> to vector<8xf32>
    %2 = vector.shape_cast %1 : vector<8xf32> to vector<8x1xf32>
    %cst_1 = arith.constant 3.906250e-03 : f32
    %3 = vector.broadcast %cst_1 : f32 to vector<8x1xf32>
    %4 = arith.mulf %2, %3 : vector<8x1xf32>
    %cst_2 = arith.constant dense<0xFF800000> : vector<8xf32>
    %5 = vector.multi_reduction <maximumf>, %0, %cst_2 [1] : vector<8x256xf32> to vector<8xf32>
    %6 = vector.shape_cast %5 : vector<8xf32> to vector<8x1xf32>
    %7 = tpu.concatenate %4, %6 in 1 : vector<8x1xf32>, vector<8x1xf32> -> vector<8x2xf32>
    %c0_3 = arith.constant 0 : index
    %c0_4 = arith.constant 0 : index
    %8 = vector.load %arg2[%c0_3, %c0_4] : memref<8x2xf32, #tpu.memory_space<vmem>>, vector<8x2xf32>
    tpu.vector_store %arg2[%c0_3, %c0_4], %7 {strides = array<i32>} : memref<8x2xf32, #tpu.memory_space<vmem>>, vector<8x2xf32>,
    return
  }
  func.func @transform_0(%arg0: i32) -> (i32, i32) {
    %c0_i32 = arith.constant 0 : i32
    %c0_i32_0 = arith.constant 0 : i32
    return %arg0, %c0_i32 : i32, i32
  }
  func.func @transform_1(%arg0: i32) -> (i32, i32) {
    %c0_i32 = arith.constant 0 : i32
    %c0_i32_0 = arith.constant 0 : i32
    return %arg0, %c0_i32 : i32, i32
  }
}

</mosaic_0001>

<bundles_post_ra>
// kernel: tpu_custom_call.1
= control target key start
LH: loop header
LB: loop body
LE: loop exit
PB: predicated region body
PF: predicated region fallthrough
CT: control target
= control target key end

     0   :  { %6 = vsyncpa [#allocation3], 0  ;;  %s61_s6 = smov [#allocation2]   ;;  %s78_s0 = inlined_call_operand.hbm [shape: f32[8,256], index: 0, kind: input, shape index: {}]   ;;  %s79_s1 = inlined_call_operand.vmem [shape: f32[8,2], index: 1, kind: output, shape index: {}]  }
   0x1   :  { %s13_s7 = sshll.u32 %s61_s6, 4  ;;  %s14_s7 = int_to_ptr.vmem [resolvable:$true] %s13_s7 }
   0x2   :  { %s47_s8 = scalar_lea.vmem %s14_s7, 256  ;;  %p52_p1 = scmp.lt.s32.totalorder %s14_s7, %s14_s7 }
   0x3   :  { %p48_p0 = scmp.ne.s32.totalorder %s14_s7, %s47_s8  ;;  %p53_p2 = scmp.lt.s32.totalorder %s47_s8, %s47_s8 }
   0x5   :  { %p54_p3 = por %p53_p2, %p52_p1 }
   0x7   :  { %p55_p4 = pnand %p54_p3, %p48_p0 }
   0x9   :  { %58 = shalt.err (!%p55_p4)
}
   0xa   :  { %16 = dma.hbm_to_vmem [thread:$0]  %s78_s0, 256, %s14_s7, [#allocation3]  }
   0xb   :  { %59 = dma.done.wait [#allocation3], 256  }
   0xc   :  { %60 = vsyncadd [#allocation3], 4294967040  ;;  %v20_v0 = vld [vmem:[#allocation2] sm:$0xff]  ;;  %v21_v1 = vld [vmem:[#allocation2 + $0x8] sm:$0xff]  ;;  %vm29_vm0 = vcmask 7168   ;;  %vm31_vm1 = vcmask 15360  }
   0xd   :  { %v22_v2 = vadd.f32 %v21_v1, %v20_v0  ;;  %v26_v3 = vmax.f32 %v20_v0, %v21_v1 }
   0xf   :  { %23 = vadd.xlane.f32.xlu0 %v22_v2 }
  0x13   :  { %27 = vmax.xlane.f32.xlu0 %v26_v3 }
  0x98   :  { %v24_v4 = vpop.xlane.xlu0 %23 }
  0x99   :  { %v25_v5 = vmul.f32 0.00390625, %v24_v4 }
  0x9c   :  { %v28_v6 = vpop.xlane.xlu0 %27 }
  0x9d   :  { %v30_v7 = vsel %vm29_vm0, %v25_v5, %v28_v6 }
  0x9e   :  { %32 = vst.msk [vmem:[%s79_s1] sm:$0xff] %vm31_vm1, %v30_v7 }
  0x9f   :  { %37 = vsyncpa [#allocation3], 1 }

</bundles_post_ra>
